<compile_context>
chip_gen: v7x
topology: tpu7x:2x2x1
jax: 0.10.0
libtpu: 0.0.40
codegen_flags: <defaults>
</compile_context>

<pallas_src>
import jax
import jax.numpy as jnp
from jax.experimental import pallas as pl
from jax.experimental.pallas import tpu as pltpu


def _linear_kernel(x_ref, w_ref, o_ref):
    # x_ref: (TM, d_inp)   w_ref: (d_inp, d_model)   o_ref: (TM, d_model)
    o_ref[...] = jnp.dot(
        x_ref[...], w_ref[...], preferred_element_type=jnp.float32
    ).astype(o_ref.dtype)


def time_feature_embedding(x: jax.Array, weight: jax.Array, *, block_rows: int = 512):
    """Equivalent of nn.Linear(d_inp, d_model, bias=False)(x).

    x:      (B, L, d_inp)
    weight: (d_model, d_inp)   -- PyTorch nn.Linear layout
    returns (B, L, d_model)
    """
    B, L, d_inp = x.shape
    d_model = weight.shape[0]
    assert weight.shape == (d_model, d_inp)

    w_t = weight.T  # (d_inp, d_model): contraction dim on sublanes, d_model on lanes

    M = B * L
    x2 = x.reshape(M, d_inp)

    # Row-tile size: multiple of 8 (sublane tiling), capped at block_rows.
    tm = min(block_rows, M)
    tm = ((tm + 7) // 8) * 8
    m_pad = pl.cdiv(M, tm) * tm
    if m_pad != M:
        x2 = jnp.pad(x2, ((0, m_pad - M), (0, 0)))

    grid = (m_pad // tm,)

    itemsize = jnp.dtype(x.dtype).itemsize
    cost = pl.CostEstimate(
        flops=2 * M * d_inp * d_model,
        transcendentals=0,
        bytes_accessed=(M * d_inp + d_inp * d_model + M * d_model) * itemsize,
    )

    out = pl.pallas_call(
        _linear_kernel,
        out_shape=jax.ShapeDtypeStruct((m_pad, d_model), x.dtype),
        grid=grid,
        in_specs=[
            pl.BlockSpec((tm, d_inp), lambda i: (i, 0)),       # activations, tiled rows
            pl.BlockSpec((d_inp, d_model), lambda i: (0, 0)),  # weight, resident
        ],
        out_specs=pl.BlockSpec((tm, d_model), lambda i: (i, 0)),
        compiler_params=pltpu.CompilerParams(
            dimension_semantics=("parallel",)
        ),
        cost_estimate=cost,
    )(x2, w_t)

    return out[:M].reshape(B, L, d_model)


def _reference(x: jax.Array, weight: jax.Array):
    # Pure-JAX reference mirroring nn.Linear(..., bias=False): x @ W.T
    return jnp.einsum("bld,md->blm", x, weight)


if __name__ == "__main__":
    # freq='h' -> d_inp = 4 time features; small d_model for the test.
    d_inp = 4
    d_model = 32
    B, L = 2, 16

    key = jax.random.PRNGKey(0)
    kx, kw = jax.random.split(key)
    x = jax.random.normal(kx, (B, L, d_inp), dtype=jnp.float32)
    # Match nn.Linear default init scale (uniform in +-1/sqrt(d_inp)); exact init
    # doesn't matter for correctness of the forward pass.
    weight = jax.random.uniform(
        kw, (d_model, d_inp), dtype=jnp.float32,
        minval=-1.0 / (d_inp ** 0.5), maxval=1.0 / (d_inp ** 0.5),
    )

    # Use a small block_rows so the tiny test still exercises a multi-step grid.
    y = time_feature_embedding(x, weight, block_rows=8)
    jax.block_until_ready(y)

    y_ref = _reference(x, weight)
    assert y.shape == (B, L, d_model)
    assert jnp.allclose(y, y_ref, atol=1e-5, rtol=1e-5)

    print("KERNEL_OK")
</pallas_src>

<mosaic_0001>
module attributes {stable_mosaic.version = 11 : i64} {
  func.func @_linear_kernel(%arg0: i32, %arg1: memref<8x4xf32, #tpu.memory_space<vmem>>, %arg2: memref<4x32xf32, #tpu.memory_space<vmem>>, %arg3: memref<8x32xf32, #tpu.memory_space<vmem>>) attributes {dimension_semantics = [#tpu.dimension_semantics<parallel>], iteration_bounds = array<i64: 4>, scalar_prefetch = 0 : i64, scratch_operands = 0 : i64, tpu.core_type = #tpu.core_type<tc>, window_params = [{transform_indices = @transform_0, window_bounds = array<i64: 8, 4>}, {pipeline_mode = #tpu.pipeline_mode<synchronous>, transform_indices = @transform_1, window_bounds = array<i64: 4, 32>}, {transform_indices = @transform_2, window_bounds = array<i64: 8, 32>}]} {
    %c0 = arith.constant 0 : index
    %c0_0 = arith.constant 0 : index
    %0 = vector.load %arg1[%c0, %c0_0] : memref<8x4xf32, #tpu.memory_space<vmem>>, vector<8x4xf32>
    %c0_1 = arith.constant 0 : index
    %c0_2 = arith.constant 0 : index
    %1 = vector.load %arg2[%c0_1, %c0_2] : memref<4x32xf32, #tpu.memory_space<vmem>>, vector<4x32xf32>
    %cst = arith.constant dense<0.000000e+00> : vector<8x32xf32>
    %2 = tpu.matmul %0, %1, %cst {dimension_numbers = #tpu.dot_dimension_numbers<[1], [0], [0], [1], [0, 0, 1, 1], [], []>} : vector<8x4xf32>, vector<4x32xf32>, vector<8x32xf32> -> vector<8x32xf32>
    %c0_3 = arith.constant 0 : index
    %c0_4 = arith.constant 0 : index
    %3 = vector.load %arg3[%c0_3, %c0_4] : memref<8x32xf32, #tpu.memory_space<vmem>>, vector<8x32xf32>
    tpu.vector_store %arg3[%c0_3, %c0_4], %2 {strides = array<i32>} : memref<8x32xf32, #tpu.memory_space<vmem>>, vector<8x32xf32>,
    return
  }
  func.func @transform_0(%arg0: i32) -> (i32, i32) {
    %c0_i32 = arith.constant 0 : i32
    %c0_i32_0 = arith.constant 0 : i32
    return %arg0, %c0_i32 : i32, i32
  }
  func.func @transform_1(%arg0: i32) -> (i32, i32) {
    %c0_i32 = arith.constant 0 : i32
    %c0_i32_0 = arith.constant 0 : i32
    %c0_i32_1 = arith.constant 0 : i32
    return %c0_i32, %c0_i32_0 : i32, i32
  }
  func.func @transform_2(%arg0: i32) -> (i32, i32) {
    %c0_i32 = arith.constant 0 : i32
    %c0_i32_0 = arith.constant 0 : i32
    return %arg0, %c0_i32 : i32, i32
  }
}

</mosaic_0001>

<bundles_post_ra>
// kernel: tpu_custom_call.1
= control target key start
LH: loop header
LB: loop body
LE: loop exit
PB: predicated region body
PF: predicated region fallthrough
CT: control target
= control target key end

     0   :  { %7 = vsyncpa [#allocation3], 0  ;;  %s539_s0 = inlined_call_operand.vmem [shape: f32[32,4], index: 0, kind: input, shape index: {}]   ;;  %s540_s1 = inlined_call_operand.vmem [shape: f32[4,32], index: 1, kind: input, shape index: {}]   ;;  %s541_s2 = inlined_call_operand.hbm [shape: f32[32,32], index: 2, kind: output, shape index: {}]  }
   0x1   :  { %9 = vsyncpa [#allocation3 + $0x1], 0  ;;  %s436_s9 = smov 0   ;;  %s438_s10 = smov 0  }
   0x2   :  { %s440_s11 = smov 0   ;;  %s442_s12 = smov 0  }
   0x3 LB: > { %s457_s13 = sadd.s32 4294967295, %s416_s12   ;;  %s294_s14 = sadd.s32 4294967294, %s416_s12   ;;  %s416_s12 = sphi %s442_s12, %s547_s12   ;;  %s412_s11 = sphi %s440_s11, %s546_s11   ;;  %s408_s10 = sphi %s438_s10, %s545_s10   ;;  %s404_s9 = sphi %s436_s9, %s544_s9  }
   0x4   : > { %s461_s15 = sadd.s32 1, %s416_s12   ;;  %s69_s16 = sadd.s32 1, %s412_s11 }
   0x5   : > { %s66_s17 = ssub.s32 %s416_s12, %s461_s15  ;;  %p79_p0 = scmp.ne.s32.totalorder %s412_s11, %s408_s10 }
   0x6   : > { %p67_p1 = scmp.eq.s32.totalorder %s66_s17, 0  ;;  %p80_p2 = scmp.eq.s32.totalorder %s457_s13, 3 }
   0x7   : > { %p85_p3 = scmp.ne.s32.totalorder %s408_s10, %s404_s9  ;;  %p86_p4 = scmp.eq.s32.totalorder %s294_s14, 3 }
   0x8   : > { %s472_s18 = scalar_select %p67_p1, %s412_s11, %s69_s16  }
   0x9   : > { %p474_p5 = por %p80_p2, %p79_p0  ;;  %p478_p6 = por %p86_p4, %p85_p3 }
   0xa   : > { %p297_p7 = scmp.ge.s32.totalorder %s416_s12, 1  ;;  %p114_p8 = scmp.lt.s32.totalorder %s416_s12, 5 }
   0xc   : > { %p115_p9 = pnand %p297_p7, %p114_p8 }
   0xd   : > { %v140_v0 = vld [vmem:[%s540_s1] sm:$0xf] (!%p115_p9)  ;;  %vm145_vm0 = vcmask (!%p115_p9), 1043456   ;;  %p135_p10 = scmp.lt.s32.totalorder (!%p115_p9), %s457_s13, 3  ;;  %v418_v1 = vmov (!%p115_p9), 0.0   ;;  %vm419_vm1 = vmmov (!%p115_p9), 0  }
   0xe   : > { %118 = sbr.rel (%p115_p9) target bundleno = 252 (0xfc), region = 28  ;;  %308 = vmatprep.subr.mxu0 (!%p115_p9), %v418_v1  ;;  %310 = vmatprep.mubr.msk.f32.mxu0 (!%p115_p9), %vm419_vm1, %v418_v1  ;;  %vm141_vm2 = vcmask (!%p115_p9), 31744   ;;  %s132_s28 = sand.u32 (!%p115_p9), 1, %s408_s10   ;;  %vm219_vm3 = vcmask (!%p115_p9), 261120  }
   0xf   : > { %309 = vmatpush3.msk.msra.mxu0 (!%p115_p9), %vm145_vm0, %v140_v0  ;;  %s298_s29 = sshll.u32 (!%p115_p9), %s132_s28, 3  ;;  %s303_s30 = sshll.u32 (!%p115_p9), %s457_s13, 7 }
  0x10   : > { %s134_s3 = scalar_lea.vmem (!%p115_p9), [#allocation2], %s298_s29  ;;  %s497_s7 = scalar_lea.hbm (!%p115_p9), %s541_s2, %s303_s30 }
  0x11   : > { %s235_s4 = sshll.u32 (!%p115_p9), %s134_s3, 4  ;;  %s222_s8 = scalar_lea.sflag (!%p115_p9), [#allocation3], %s132_s28  ;;  %s499_s4 = int_to_ptr.vmem [resolvable:$true] %s235_s4 }
  0x12   : > { %s354_s14 = scalar_lea.vmem (!%p115_p9), %s499_s4, 128 }
  0x13   : > { %p355_p11 = scmp.ne.s32.totalorder (!%p115_p9), %s499_s4, %s354_s14 }
  0x15   : > { %s136_s23 = scalar_select %p135_p10, %s457_s13, 3 }
  0x16   : > { %p356_p12 = pnand %p355_p11, %p474_p5  ;;  %s420_s13 = smov [#allocation2]  }
  0x17   : > { %s299_s24 = sshll.u32 %s136_s23, 3  ;;  %s358_s16 = sshll.u32 %s420_s13, 4  ;;  %s359_s16 = int_to_ptr.vmem [resolvable:$false] %s358_s16 }
  0x18   : > { %s138_s27 = scalar_lea.vmem %s539_s0, %s299_s24  ;;  %p357_p13 = pneg %p356_p12 }
  0x19   : > { %v139_v2 = vld [vmem:[%s138_s27] sm:$0xff]  ;;  %s360_s17 = scalar_lea.vmem %s359_s16, 256  ;;  %p361_p0 = scmp.lt.s32.totalorder %s499_s4, %s359_s16 }
  0x1a   : > { %311 = vmatmul.mubr.msk.f32.vlgmr.msra.gmra.mrb[0].mxu0 %vm141_vm2, %v139_v2  ;;  %p362_p1 = scmp.lt.s32.totalorder %s360_s17, %s354_s14 }
  0x1c   : > { %p363_p2 = por %p362_p1, %p361_p0 }
  0x1e   : > { %p364_p3 = pnand %p363_p2, %p357_p13 }
  0xed   : > { %v215_v3 = vpop.f32.mrb[0].mxu0 }
  0xee   : > { %220 = vst.msk [vmem:[%s134_s3] sm:$0xff] %vm219_vm3, %v215_v3  ;;  %v312_v4 = vpop.f32.mrb[1].mxu0 }
  0xef   : > { %367 = shalt.err (!%p364_p3)
}
  0xf0   : > { %s368_s21 = scalar_lea.hbm %s497_s7, 128  ;;  %s372_s24 = scalar_lea.hbm %s541_s2, 512 }
  0xf1   : > { %p369_p4 = scmp.ne.s32.totalorder %s497_s7, %s368_s21  ;;  %p373_p9 = scmp.lt.u32.totalorder %s497_s7, %s541_s2 }
  0xf2   : > { %p374_p10 = scmp.lt.u32.totalorder %s372_s24, %s368_s21  ;;  %p376_p12 = scmp.lt.u32.totalorder %s368_s21, %s497_s7 }
  0xf3   : > { %p370_p7 = pnand %p369_p4, %p474_p5 }
  0xf4   : > { %p375_p11 = por %p374_p10, %p373_p9 }
  0xf5   : > { %p371_p8 = pneg %p370_p7 }
  0xf6   : > { %p377_p13 = por %p376_p12, %p375_p11 }
  0xf8   : > { %p378_p0 = pnand %p377_p13, %p371_p8 }
  0xfa   : > { %381 = shalt.err (!%p378_p0)
}
  0xfb   : > { %313 = dma.vmem_to_hbm [thread:$0]  (%p474_p5), %s499_s4, 128, %s497_s7, %s222_s8  }
  0xfc PF: > { %p319_p1 = scmp.ge.s32.totalorder %s416_s12, 2  ;;  %s247_s27 = sand.u32 1, %s404_s9  }
  0xfd   : > { %s248_s28 = scalar_lea.sflag [#allocation3], %s247_s27 }
  0xfe   : > { %p316_p2 = pnand %p319_p1, %p478_p6 }
 0x100   : > { %399 = dma.done.wait (!%p316_p2), %s248_s28, 128  }
 0x101   : > { %401 = vsyncadd (!%p316_p2), %s248_s28, 4294967168  ;;  %p12_p3 = scmp.ge.s32.totalorder %s461_s15, 6   ;;  %s544_s9 = smov %s408_s10 }
 0x102   : > { %s545_s10 = smov %s412_s11  ;;  %s546_s11 = smov %s472_s18 }
 0x103   : > { %s547_s12 = smov %s461_s15  ;;  %14 = sbr.rel (!%p12_p3) target bundleno = 3 (0x3), region = 63 }
 0x10a   :  { %253 = vsyncpa [#allocation3], 1 }
 0x10b   :  { %255 = vsyncpa [#allocation3 + $0x1], 1 }

</bundles_post_ra>
